<compile_context>
chip_gen: v7x
topology: tpu7x:2x2x1
jax: 0.10.0
libtpu: 0.0.40
codegen_flags: <defaults>
</compile_context>

<pallas_src>
import functools

import jax
import jax.numpy as jnp
import numpy as np
from jax import lax
from jax.experimental import pallas as pl
from jax.experimental.pallas import tpu as pltpu


def _cross_scale_attn_kernel(x_ref, y_ref, wq_ref, bq_ref, wkv_ref, bkv_ref,
                             o_ref, *, c_hr, n_lr_valid, attn_dtype):
    x = x_ref[0]                                   # (C, TQ)       channel-major
    y = y_ref[0]                                   # (Cl, N_lr_pad)

    # 1x1 conv + folded BN == channel matmul + per-channel bias.
    q = jnp.dot(wq_ref[...], x, preferred_element_type=jnp.float32) + bq_ref[...]
    kv = jnp.dot(wkv_ref[...], y, preferred_element_type=jnp.float32) + bkv_ref[...]
    k = kv[:c_hr]                                  # (C, N_lr_pad)
    v = kv[c_hr:]                                  # (C, N_lr_pad)

    # Scores kept as (N_lr_pad, TQ): queries stay on the lane axis; the channel
    # contraction is expressed directly with dot_general (no materialized .T).
    s = lax.dot_general(k.astype(attn_dtype), q.astype(attn_dtype),
                        (((0,), (0,)), ((), ())),
                        preferred_element_type=jnp.float32)

    if s.shape[0] != n_lr_valid:                   # static: mask lane padding
        row = lax.broadcasted_iota(jnp.int32, s.shape, 0)
        s = jnp.where(row < n_lr_valid, s, -1e30)

    # Softmax over the LR-token axis (axis 0); normalization via EUP reciprocal.
    m = jnp.max(s, axis=0, keepdims=True)          # (1, TQ)
    p = jnp.exp(s - m)                             # (N_lr_pad, TQ)
    l = jnp.sum(p, axis=0, keepdims=True)          # (1, TQ)
    inv_l = pl.reciprocal(l, approx=True)

    # PV product directly in channel-major form: (C, N_lr_pad) @ (N_lr_pad, TQ).
    attn = jnp.dot(v.astype(attn_dtype), p.astype(attn_dtype),
                   preferred_element_type=jnp.float32)

    # Residual + lane-dense store.
    o_ref[0] = (x + attn * inv_l).astype(o_ref.dtype)


def _choose_tq(n_hr, cap=512):
    """Largest query tile <= cap (v7x-safe VMEM budget) that divides N_hr."""
    if n_hr <= cap:
        return n_hr
    for t in (512, 384, 256, 128):
        if t <= cap and n_hr % t == 0:
            return t
    return n_hr


def cross_scale_attention(x, y, params, *, tq=None, attn_dtype=jnp.bfloat16):
    """x: (B, C_hr, Hx, Wx), y: (B, C_lr, Hy, Wy) -> (B, C_hr, Hx, Wx)."""
    B, C, H, W = x.shape
    _, Cl, Hy, Wy = y.shape
    N_hr, N_lr = H * W, Hy * Wy

    wq, bq, wk, bk, wv, bv = params        # channel-major: (Cout, Cin), (Cout, 1)
    wkv = jnp.concatenate([wk, wv], axis=0)   # (2C, Cl)  fused K/V projection
    bkv = jnp.concatenate([bk, bv], axis=0)   # (2C, 1)

    # Channel-major token views: pure reshapes of NCHW, no transposes.
    x_cm = x.reshape(B, C, N_hr)
    y_cm = y.reshape(B, Cl, N_lr)

    # Lane-pad the LR token axis to a multiple of 128 (masked in-kernel).
    n_lr_pad = ((N_lr + 127) // 128) * 128
    if n_lr_pad != N_lr:
        y_cm = jnp.pad(y_cm, ((0, 0), (0, 0), (0, n_lr_pad - N_lr)))

    if tq is None:
        tq = _choose_tq(N_hr)
    assert N_hr % tq == 0, "query tile must divide N_hr"

    # TODO(synk): for very large LR maps, add an inner "arbitrary" grid axis over
    # N_lr tiles with flash-style (m, l, acc) online softmax so the (N_lr, TQ)
    # score tile stays bounded independently of LR resolution.

    kernel = functools.partial(_cross_scale_attn_kernel, c_hr=C,
                               n_lr_valid=N_lr, attn_dtype=attn_dtype)

    out_cm = pl.pallas_call(
        kernel,
        out_shape=jax.ShapeDtypeStruct((B, C, N_hr), x.dtype),
        grid_spec=pltpu.PrefetchScalarGridSpec(
            num_scalar_prefetch=0,
            grid=(B, N_hr // tq),
            in_specs=[
                pl.BlockSpec((1, C, tq), lambda b, qi: (b, 0, qi)),
                pl.BlockSpec((1, Cl, n_lr_pad), lambda b, qi: (b, 0, 0)),
                pl.BlockSpec((C, C), lambda b, qi: (0, 0)),
                pl.BlockSpec((C, 1), lambda b, qi: (0, 0)),
                pl.BlockSpec((2 * C, Cl), lambda b, qi: (0, 0)),
                pl.BlockSpec((2 * C, 1), lambda b, qi: (0, 0)),
            ],
            out_specs=pl.BlockSpec((1, C, tq), lambda b, qi: (b, 0, qi)),
        ),
        compiler_params=pltpu.CompilerParams(
            dimension_semantics=("parallel", "parallel"),
            vmem_limit_bytes=48 * 1024 * 1024),
    )(x_cm, y_cm, wq, bq, wkv, bkv)

    return out_cm.reshape(B, C, H, W)


def init_params(key, in_ch_HR, in_ch_LR):
    """Deterministic params for conv_HR / conv_LR_k / conv_LR_v with BN folded
    (BatchNorm2d in eval mode: running_mean=0, running_var=1, eps=1e-5).
    Channel-major: weight (Cout, Cin), bias (Cout, 1)."""
    eps = 1e-5
    ks = jax.random.split(key, 12)

    def branch(kw, kb, kg, kbt, cin, cout):
        w = 0.1 * jax.random.normal(kw, (cout, cin), jnp.float32)
        b = 0.1 * jax.random.normal(kb, (cout,), jnp.float32)
        gamma = 1.0 + 0.1 * jax.random.normal(kg, (cout,), jnp.float32)
        beta = 0.1 * jax.random.normal(kbt, (cout,), jnp.float32)
        mean = jnp.zeros((cout,), jnp.float32)
        var = jnp.ones((cout,), jnp.float32)
        scale = gamma / jnp.sqrt(var + eps)
        w_eff = w * scale[:, None]                      # (cout, cin)
        b_eff = ((b - mean) * scale + beta)[:, None]    # (cout, 1)
        return w_eff, b_eff

    wq, bq = branch(ks[0], ks[1], ks[2], ks[3], in_ch_HR, in_ch_HR)
    wk, bk = branch(ks[4], ks[5], ks[6], ks[7], in_ch_LR, in_ch_HR)
    wv, bv = branch(ks[8], ks[9], ks[10], ks[11], in_ch_LR, in_ch_HR)
    return (wq, bq, wk, bk, wv, bv)


def reference(x, y, params):
    """Plain-JAX reference matching the PyTorch forward (BN folded, eval mode)."""
    wq, bq, wk, bk, wv, bv = params
    B, C, H, W = x.shape
    _, Cl, Hy, Wy = y.shape
    xf = x.reshape(B, C, H * W)            # (B, C, N_hr)
    yf = y.reshape(B, Cl, Hy * Wy)         # (B, Cl, N_lr)
    Q = jnp.einsum('oc,bcn->bon', wq, xf) + bq[None]   # (B, C, N_hr)
    K = jnp.einsum('oc,bcn->bon', wk, yf) + bk[None]   # (B, C, N_lr)
    V = jnp.einsum('oc,bcn->bon', wv, yf) + bv[None]   # (B, C, N_lr)
    s = jnp.einsum('bcq,bck->bqk', Q, K)               # (B, N_hr, N_lr)
    p = jax.nn.softmax(s, axis=-1)
    attn = jnp.einsum('bqk,bck->bcq', p, V)            # (B, C, N_hr)
    return (xf + attn).reshape(B, C, H, W)


if __name__ == "__main__":
    in_ch_HR, in_ch_LR = 4, 8
    B, H, W = 2, 16, 16

    key = jax.random.PRNGKey(0)
    kx, ky, kp = jax.random.split(key, 3)
    x = jax.random.normal(kx, (B, in_ch_HR, H, W), jnp.float32)
    y = jax.random.normal(ky, (B, in_ch_LR, H // 2, W // 2), jnp.float32)
    params = init_params(kp, in_ch_HR, in_ch_LR)

    ref = jax.block_until_ready(reference(x, y, params))

    # f32 attention matmuls: tight check (only approx-reciprocal softmax differs).
    out_f32 = jax.block_until_ready(
        cross_scale_attention(x, y, params, tq=128, attn_dtype=jnp.float32))
    np.testing.assert_allclose(np.asarray(out_f32), np.asarray(ref),
                               rtol=5e-3, atol=5e-3)

    # Default path: bf16 MXU operands for the two attention matmuls (f32 accum).
    out = jax.block_until_ready(cross_scale_attention(x, y, params, tq=128))
    np.testing.assert_allclose(np.asarray(out), np.asarray(ref),
                               rtol=2e-2, atol=2e-2)

    assert out.shape == x.shape and out.dtype == x.dtype
    print("KERNEL_OK")
</pallas_src>

<mosaic_0001>
module attributes {stable_mosaic.version = 11 : i64} {
  func.func @_cross_scale_attn_kernel(%arg0: i32, %arg1: i32, %arg2: memref<1x4x128xf32, #tpu.memory_space<vmem>>, %arg3: memref<1x8x128xf32, #tpu.memory_space<vmem>>, %arg4: memref<4x4xf32, #tpu.memory_space<vmem>>, %arg5: memref<4x1xf32, #tpu.memory_space<vmem>>, %arg6: memref<8x8xf32, #tpu.memory_space<vmem>>, %arg7: memref<8x1xf32, #tpu.memory_space<vmem>>, %arg8: memref<1x4x128xf32, #tpu.memory_space<vmem>>) attributes {dimension_semantics = [#tpu.dimension_semantics<parallel>, #tpu.dimension_semantics<parallel>], iteration_bounds = array<i64: 2, 2>, scalar_prefetch = 0 : i64, scratch_operands = 0 : i64, tpu.core_type = #tpu.core_type<tc>, window_params = [{transform_indices = @transform_0, window_bounds = array<i64: 1, 4, 128>}, {transform_indices = @transform_1, window_bounds = array<i64: 1, 8, 128>}, {pipeline_mode = #tpu.pipeline_mode<synchronous>, transform_indices = @transform_2, window_bounds = array<i64: 4, 4>}, {pipeline_mode = #tpu.pipeline_mode<synchronous>, transform_indices = @transform_3, window_bounds = array<i64: 4, 1>}, {pipeline_mode = #tpu.pipeline_mode<synchronous>, transform_indices = @transform_4, window_bounds = array<i64: 8, 8>}, {pipeline_mode = #tpu.pipeline_mode<synchronous>, transform_indices = @transform_5, window_bounds = array<i64: 8, 1>}, {transform_indices = @transform_6, window_bounds = array<i64: 1, 4, 128>}]} {
    %c0 = arith.constant 0 : index
    %c0_0 = arith.constant 0 : index
    %c0_1 = arith.constant 0 : index
    %0 = vector.load %arg2[%c0, %c0_0, %c0_1] : memref<1x4x128xf32, #tpu.memory_space<vmem>>, vector<1x4x128xf32>
    %1 = vector.shape_cast %0 : vector<1x4x128xf32> to vector<4x128xf32>
    %c0_2 = arith.constant 0 : index
    %c0_3 = arith.constant 0 : index
    %c0_4 = arith.constant 0 : index
    %2 = vector.load %arg3[%c0_2, %c0_3, %c0_4] : memref<1x8x128xf32, #tpu.memory_space<vmem>>, vector<1x8x128xf32>
    %3 = vector.shape_cast %2 : vector<1x8x128xf32> to vector<8x128xf32>
    %c0_5 = arith.constant 0 : index
    %c0_6 = arith.constant 0 : index
    %4 = vector.load %arg4[%c0_5, %c0_6] : memref<4x4xf32, #tpu.memory_space<vmem>>, vector<4x4xf32>
    %cst = arith.constant dense<0.000000e+00> : vector<4x128xf32>
    %5 = tpu.matmul %4, %1, %cst {dimension_numbers = #tpu.dot_dimension_numbers<[1], [0], [0], [1], [0, 0, 1, 1], [], []>} : vector<4x4xf32>, vector<4x128xf32>, vector<4x128xf32> -> vector<4x128xf32>
    %c0_7 = arith.constant 0 : index
    %c0_8 = arith.constant 0 : index
    %6 = vector.load %arg5[%c0_7, %c0_8] : memref<4x1xf32, #tpu.memory_space<vmem>>, vector<4x1xf32>
    %7 = vector.broadcast %6 : vector<4x1xf32> to vector<4x128xf32>
    %8 = arith.addf %5, %7 : vector<4x128xf32>
    %c0_9 = arith.constant 0 : index
    %c0_10 = arith.constant 0 : index
    %9 = vector.load %arg6[%c0_9, %c0_10] : memref<8x8xf32, #tpu.memory_space<vmem>>, vector<8x8xf32>
    %cst_11 = arith.constant dense<0.000000e+00> : vector<8x128xf32>
    %10 = tpu.matmul %9, %3, %cst_11 {dimension_numbers = #tpu.dot_dimension_numbers<[1], [0], [0], [1], [0, 0, 1, 1], [], []>} : vector<8x8xf32>, vector<8x128xf32>, vector<8x128xf32> -> vector<8x128xf32>
    %c0_12 = arith.constant 0 : index
    %c0_13 = arith.constant 0 : index
    %11 = vector.load %arg7[%c0_12, %c0_13] : memref<8x1xf32, #tpu.memory_space<vmem>>, vector<8x1xf32>
    %12 = vector.broadcast %11 : vector<8x1xf32> to vector<8x128xf32>
    %13 = arith.addf %10, %12 : vector<8x128xf32>
    %14 = vector.extract_strided_slice %13 {offsets = [0, 0], sizes = [4, 128], strides = [1, 1]} : vector<8x128xf32> to vector<4x128xf32>
    %15 = vector.extract_strided_slice %13 {offsets = [4, 0], sizes = [4, 128], strides = [1, 1]} : vector<8x128xf32> to vector<4x128xf32>
    %cst_14 = arith.constant dense<0.000000e+00> : vector<128x128xf32>
    %16 = tpu.matmul %14, %8, %cst_14 {dimension_numbers = #tpu.dot_dimension_numbers<[0], [0], [1], [1], [0, 1, 1, 1], [], []>} : vector<4x128xf32>, vector<4x128xf32>, vector<128x128xf32> -> vector<128x128xf32>
    %17 = tpu.iota {dimensions = array<i32: 0>} : vector<128x128xi32>
    %c64_i32 = arith.constant 64 : i32
    %18 = vector.broadcast %c64_i32 : i32 to vector<128x128xi32>
    %19 = arith.cmpi slt, %17, %18 : vector<128x128xi32>
    %cst_15 = arith.constant -1.000000e+30 : f32
    %20 = vector.broadcast %cst_15 : f32 to vector<128x128xf32>
    %21 = arith.select %19, %16, %20 : vector<128x128xi1>, vector<128x128xf32>
    %cst_16 = arith.constant dense<0xFF800000> : vector<128xf32>
    %22 = vector.multi_reduction <maximumf>, %21, %cst_16 [0] : vector<128x128xf32> to vector<128xf32>
    %23 = vector.shape_cast %22 : vector<128xf32> to vector<1x128xf32>
    %24 = vector.broadcast %23 : vector<1x128xf32> to vector<128x128xf32>
    %25 = arith.subf %21, %24 : vector<128x128xf32>
    %26 = math.exp %25 : vector<128x128xf32>
    %cst_17 = arith.constant dense<0.000000e+00> : vector<128xf32>
    %27 = vector.multi_reduction <add>, %26, %cst_17 [0] : vector<128x128xf32> to vector<128xf32>
    %28 = vector.shape_cast %27 : vector<128xf32> to vector<1x128xf32>
    %29 = tpu.reciprocal %28 {approx = true} : vector<1x128xf32> -> vector<1x128xf32>
    %cst_18 = arith.constant dense<0.000000e+00> : vector<4x128xf32>
    %30 = tpu.matmul %15, %26, %cst_18 {dimension_numbers = #tpu.dot_dimension_numbers<[1], [0], [0], [1], [0, 0, 1, 1], [], []>} : vector<4x128xf32>, vector<128x128xf32>, vector<4x128xf32> -> vector<4x128xf32>
    %31 = vector.broadcast %29 : vector<1x128xf32> to vector<4x128xf32>
    %32 = arith.mulf %30, %31 : vector<4x128xf32>
    %33 = arith.addf %1, %32 : vector<4x128xf32>
    %c0_19 = arith.constant 0 : index
    %c0_20 = arith.constant 0 : index
    %c0_21 = arith.constant 0 : index
    %34 = vector.load %arg8[%c0_19, %c0_20, %c0_21] : memref<1x4x128xf32, #tpu.memory_space<vmem>>, vector<1x4x128xf32>
    %35 = vector.shape_cast %34 : vector<1x4x128xf32> to vector<4x128xf32>
    %36 = vector.shape_cast %33 : vector<4x128xf32> to vector<1x4x128xf32>
    tpu.vector_store %arg8[%c0_19, %c0_20, %c0_21], %36 {strides = array<i32>} : memref<1x4x128xf32, #tpu.memory_space<vmem>>, vector<1x4x128xf32>,
    return
  }
  func.func @transform_0(%arg0: i32, %arg1: i32) -> (i32, i32, i32) {
    %c0_i32 = arith.constant 0 : i32
    %c0_i32_0 = arith.constant 0 : i32
    return %arg0, %c0_i32, %arg1 : i32, i32, i32
  }
  func.func @transform_1(%arg0: i32, %arg1: i32) -> (i32, i32, i32) {
    %c0_i32 = arith.constant 0 : i32
    %c0_i32_0 = arith.constant 0 : i32
    %c0_i32_1 = arith.constant 0 : i32
    return %arg0, %c0_i32, %c0_i32_0 : i32, i32, i32
  }
  func.func @transform_2(%arg0: i32, %arg1: i32) -> (i32, i32) {
    %c0_i32 = arith.constant 0 : i32
    %c0_i32_0 = arith.constant 0 : i32
    %c0_i32_1 = arith.constant 0 : i32
    return %c0_i32, %c0_i32_0 : i32, i32
  }
  func.func @transform_3(%arg0: i32, %arg1: i32) -> (i32, i32) {
    %c0_i32 = arith.constant 0 : i32
    %c0_i32_0 = arith.constant 0 : i32
    %c0_i32_1 = arith.constant 0 : i32
    return %c0_i32, %c0_i32_0 : i32, i32
  }
  func.func @transform_4(%arg0: i32, %arg1: i32) -> (i32, i32) {
    %c0_i32 = arith.constant 0 : i32
    %c0_i32_0 = arith.constant 0 : i32
    %c0_i32_1 = arith.constant 0 : i32
    return %c0_i32, %c0_i32_0 : i32, i32
  }
  func.func @transform_5(%arg0: i32, %arg1: i32) -> (i32, i32) {
    %c0_i32 = arith.constant 0 : i32
    %c0_i32_0 = arith.constant 0 : i32
    %c0_i32_1 = arith.constant 0 : i32
    return %c0_i32, %c0_i32_0 : i32, i32
  }
  func.func @transform_6(%arg0: i32, %arg1: i32) -> (i32, i32, i32) {
    %c0_i32 = arith.constant 0 : i32
    %c0_i32_0 = arith.constant 0 : i32
    return %arg0, %c0_i32, %arg1 : i32, i32, i32
  }
}

</mosaic_0001>

<bundles_post_ra>
// kernel: tpu_custom_call.1
= control target key start
LH: loop header
LB: loop body
LE: loop exit
PB: predicated region body
PF: predicated region fallthrough
CT: control target
= control target key end

     0   :  { %s1834_s0 = inlined_call_operand.hbm [shape: f32[2,4,256], index: 0, kind: input, shape index: {}]   ;;  %s1835_s1 = inlined_call_operand.vmem [shape: f32[2,8,128], index: 1, kind: input, shape index: {}]   ;;  %s1836_s2 = inlined_call_operand.hbm [shape: f32[4,4], index: 2, kind: input, shape index: {}]   ;;  %s1837_s3 = inlined_call_operand.vmem [shape: f32[4,1], index: 3, kind: input, shape index: {}]   ;;  %s1838_s4 = inlined_call_operand.vmem [shape: f32[8,8], index: 4, kind: input, shape index: {}]   ;;  %s1839_s5 = inlined_call_operand.vmem [shape: f32[8,1], index: 5, kind: input, shape index: {}]   ;;  %s1840_s6 = inlined_call_operand.hbm [shape: f32[2,4,256], index: 6, kind: output, shape index: {}]  }
   0x1   :  { %1851 = sst [smem:[#allocation16_spill]] %s1836_s2 }
   0x2   :  { %1852 = sst [smem:[#allocation17_spill]] %s1840_s6 }
   0x3   :  { %11 = vsyncpa [#allocation3], 0 }
   0x4   :  { %13 = vsyncpa [#allocation3 + $0x1], 0 }
   0x5   :  { %14 = vsyncpa [#allocation6], 0 }
   0x6   :  { %15 = vsyncpa [#allocation4], 0 }
   0x7   :  { %17 = vsyncpa [#allocation4 + $0x1], 0  ;;  %s1539_s21 = smov 0   ;;  %s1541_s22 = smov 0  }
   0x8   :  { %s1543_s23 = smov 0   ;;  %s1545_s24 = smov 0  }
   0x9   :  { %s1547_s25 = smov 0   ;;  %s1549_s26 = smov 0  }
   0xa   :  { %s1551_s27 = smov 0   ;;  %s1553_s28 = smov 0  }
   0xb LB: > { %1853 = sst [smem:[#allocation11_spill]] %s1467_s21  ;;  %s1050_s29 = sadd.s32 4294967295, %s1495_s28   ;;  %s1495_s28 = sphi %s1553_s28, %s23_s28   ;;  %s1491_s27 = sphi %s1551_s27, %s1885_s27   ;;  %s1487_s26 = sphi %s1549_s26, %s1884_s26   ;;  %s1483_s25 = sphi %s1547_s25, %s1883_s25   ;;  %s1479_s24 = sphi %s1545_s24, %s1882_s24   ;;  %s1475_s23 = sphi %s1543_s23, %s1881_s23   ;;  %s1471_s22 = sphi %s1541_s22, %s1880_s22   ;;  %s1467_s21 = sphi %s1539_s21, %s1879_s21  }
   0xc   : > { %1854 = sst [smem:[#allocation12_spill]] %s1479_s24  ;;  %s1051_s30 = sadd.s32 4294967294, %s1495_s28  }
   0xd   : > { %p57_p0 = scmp.ne.s32.totalorder %s1471_s22, %s1467_s21  ;;  %p1583_p1 = scmp.eq.s32.totalorder %s1050_s29, 0 }
   0xe   : > { %p1587_p2 = scmp.eq.s32.totalorder %s1050_s29, 3  ;;  %p199_p3 = scmp.eq.s32.totalorder %s1051_s30, 3 }
   0xf   : > { %s1855_s7 = scalar_select %p1583_p1, 1, 0 }
  0x10   : > { %s1856_s8 = scalar_select %p1587_p2, 1, 0 }
  0x11   : > { %p1593_p4 = por %p1583_p1, %p57_p0  ;;  %p1052_p5 = scmp.ge.s32.totalorder %s1495_s28, 1 }
  0x12   : > { %p1598_p6 = por %p199_p3, %p57_p0  ;;  %p206_p7 = scmp.lt.s32.totalorder %s1495_s28, 5 }
  0x13   : > { %s1857_s9 = scalar_select %p1593_p4, 1, 0 }
  0x14   : > { %s1858_s10 = scalar_select %p1598_p6, 1, 0 }
  0x15   : > { %p1603_p8 = pnand %p1052_p5, %p206_p7  ;;  %s1497_s12 = smov [#allocation5]  }
  0x16   : > { %1859 = sst [smem:[#allocation13_spill]] %s1858_s10  ;;  %s219_s13 = sshll.u32 %s1497_s12, 4  ;;  %s220_s13 = int_to_ptr.vmem [resolvable:$true] %s219_s13 }
  0x17   : > { %s1860_s11 = scalar_select %p1603_p8, 1, 0 }
  0x18   : > { %p1229_p9 = pneg %p1603_p8  ;;  %s32_s15 = sadd.s32 1, %s1487_s26 }
  0x19   : > { %s1862_s2 = sld [smem:[#allocation16_spill]] }
  0x1a   : > { %p1611_p10 = pnand %p1229_p9, %p1583_p1 }
  0x1c   : > { %p1337_p12 = pneg %p1611_p10 }
  0x1f   : > { %s1335_s18 = scalar_lea.hbm %s1862_s2, 64 }
  0x20   : > { %p1336_p11 = scmp.ne.s32.totalorder %s1862_s2, %s1335_s18  ;;  %p1342_p3 = scmp.lt.u32.totalorder %s1335_s18, %s1862_s2 }
  0x22   : > { %p1338_p13 = pnand %p1337_p12, %p1336_p11 }
  0x24   : > { %p1339_p0 = pneg %p1338_p13 }
  0x26   : > { %p1344_p5 = pnand %p1342_p3, %p1339_p0 }
  0x28   : > { %1347 = shalt.err (!%p1344_p5)
}
  0x29   : > { %s1348_s12 = scalar_lea.vmem %s220_s13, 64  ;;  %p1356_p1 = scmp.lt.s32.totalorder %s220_s13, %s220_s13 }
  0x2a   : > { %p1349_p7 = scmp.ne.s32.totalorder %s220_s13, %s1348_s12  ;;  %p1357_p4 = scmp.lt.s32.totalorder %s1348_s12, %s1348_s12 }
  0x2c   : > { %p1351_p9 = pnand %p1349_p7, %p1337_p12  ;;  %p1358_p8 = por %p1357_p4, %p1356_p1 }
  0x2e   : > { %p1352_p6 = pneg %p1351_p9 }
  0x30   : > { %p1359_p2 = pnand %p1358_p8, %p1352_p6 }
  0x32   : > { %1362 = shalt.err (!%p1359_p2)
}
  0x33   : > { %1232 = dma.hbm_to_vmem [thread:$0]  (!%p1611_p10), %s1862_s2, 64, %s220_s13, [#allocation6]  }
  0x34   : > { %p33_p1 = scmp.ge.s32.totalorder %s32_s15, 2  ;;  %s35_s18 = sadd.s32 1, %s1491_s27 }
  0x35   : > { %s44_s19 = sadd.s32 1, %s1475_s23  ;;  %p51_p2 = scmp.ne.s32.totalorder %s1475_s23, %s1471_s22 }
  0x36   : > { %s1887_s15 = smov (%p33_p1, %s32_s15), 0  ;;  %s1889_s18 = smov (!%p33_p1, %s35_s18), %s1491_s27 }
  0x37   : > { %1863 = sst [smem:[#allocation14_spill]] %s1887_s15  ;;  %s40_s14 = ssub.s32 %s1487_s26, %s1887_s15 }
  0x38   : > { %p52_p4 = scmp.eq.s32.totalorder %s1495_s28, 0  ;;  %p37_p6 = scmp.ge.s32.totalorder %s1889_s18, 2 }
  0x39   : > { %p1864_p8 = scmp.ne.s32.totalorder %s1856_s8, 0  ;;  %p1242_p12 = scmp.lt.s32.totalorder %s1495_s28, 4 }
  0x3a   : > { %p1648_p10 = por %p52_p4, %p51_p2  ;;  %s1891_s18 = smov (%p37_p6, %s1889_s18), 0 }
  0x3b   : > { %p1644_p11 = por %p1864_p8, %p51_p2  ;;  %s239_s29 = sand.u32 1, %s1475_s23  }
  0x3c   : > { %s1056_s30 = sshll.u32 %s1491_s27, 1  ;;  %s39_s12 = ssub.s32 %s1491_s27, %s1891_s18 }
  0x3d   : > { %s1865_s20 = scalar_select %p1644_p11, 1, 0 }
  0x3e   : > { %s41_s16 = sor.u32 %s40_s14, %s39_s12  ;;  %s1055_s17 = sshll.u32 %s239_s29, 2 }
  0x3f   : > { %1866 = sst [smem:[#allocation15_spill]] %s1865_s20  ;;  %p42_p13 = scmp.eq.s32.totalorder %s41_s16, 0 }
  0x40   : > { %s248_s8 = sadd.s32 %s1487_s26, %s1056_s30  ;;  %s243_s2 = scalar_lea.vmem [#allocation2], %s1055_s17 }
  0x41   : > { %s252_s15 = sshll.u32 %s243_s2, 4  ;;  %s1057_s21 = sshll.u32 %s248_s8, 6  ;;  %s1663_s15 = int_to_ptr.vmem [resolvable:$true] %s252_s15 }
  0x42   : > { %s1661_s10 = scalar_select %p42_p13, %s1475_s23, %s44_s19  }
  0x43   : > { %s1668_s24 = scalar_lea.hbm %s1834_s0, %s1057_s21  ;;  %p1674_p0 = pnand %p1242_p12, %p1648_p10 }
  0x44   : > { %s240_s2 = scalar_lea.sflag [#allocation3], %s239_s29  ;;  %s1363_s19 = scalar_lea.hbm %s1668_s24, 64 }
  0x45   : > { %p1364_p3 = scmp.ne.s32.totalorder %s1668_s24, %s1363_s19  ;;  %p1365_p5 = pneg %p1674_p0 }
  0x46   : > { %s1368_s20 = scalar_lea.hbm %s1834_s0, 256  ;;  %p1369_p1 = scmp.lt.u32.totalorder %s1668_s24, %s1834_s0 }
  0x47   : > { %p1366_p7 = pnand %p1365_p5, %p1364_p3  ;;  %p1370_p2 = scmp.lt.u32.totalorder %s1368_s20, %s1363_s19 }
  0x48   : > { %p1372_p6 = scmp.lt.u32.totalorder %s1363_s19, %s1668_s24 }
  0x49   : > { %p1367_p9 = pneg %p1366_p7  ;;  %p1371_p4 = por %p1370_p2, %p1369_p1 }
  0x4b   : > { %p1373_p8 = por %p1372_p6, %p1371_p4 }
  0x4d   : > { %p1374_p10 = pnand %p1373_p8, %p1367_p9 }
  0x4f   : > { %1377 = shalt.err (!%p1374_p10)
}
  0x50   : > { %s1378_s29 = scalar_lea.vmem %s1663_s15, 64  ;;  %s1498_s12 = smov [#allocation2]  }
  0x51   : > { %p1379_p12 = scmp.ne.s32.totalorder %s1663_s15, %s1378_s29  ;;  %s1383_s16 = sshll.u32 %s1498_s12, 4  ;;  %s1384_s16 = int_to_ptr.vmem [resolvable:$false] %s1383_s16 }
  0x52   : > { %s1385_s17 = scalar_lea.vmem %s1384_s16, 128  ;;  %p1386_p7 = scmp.lt.s32.totalorder %s1663_s15, %s1384_s16 }
  0x53   : > { %p1381_p13 = pnand %p1379_p12, %p1365_p5  ;;  %p1387_p1 = scmp.lt.s32.totalorder %s1385_s17, %s1378_s29 }
  0x55   : > { %p1382_p3 = pneg %p1381_p13  ;;  %p1388_p2 = por %p1387_p1, %p1386_p7 }
  0x57   : > { %p1389_p4 = pnand %p1388_p2, %p1382_p3 }
  0x59   : > { %1392 = shalt.err (!%p1389_p4)
}
  0x5a   : > { %1236 = dma.hbm_to_vmem [thread:$0]  (!%p1674_p0), %s1668_s24, 64, %s1663_s15, %s240_s2  }
  0x5b   : > { %p1869_p9 = scmp.ne.s32.totalorder %s1860_s11, 0 }
  0x5c   : > { %s1706_s8 = sand.u32 (!%p1869_p9), 1, %s1471_s22   ;;  %p1870_p5 = scmp.ne.s32.totalorder (!%p1869_p9), %s1857_s9, 0 }
  0x5d   : > { %268 = sbr.rel (%p1869_p9) target bundleno = 997 (0x3e5), region = 44  ;;  %s1059_s19 = sshll.u32 (!%p1869_p9), %s1706_s8, 2 }
  0x5e   : > { %s271_s6 = scalar_lea.sflag (!%p1869_p9), [#allocation3], %s1706_s8  ;;  %s274_s21 = scalar_lea.vmem (!%p1869_p9), [#allocation2], %s1059_s19 }
  0x64   : > { %1454 = dma.done.wait (%p1870_p5), %s271_s6, 64  }
  0x65   : > { %1456 = vsyncadd (%p1870_p5), %s271_s6, 4294967232  ;;  %p1871_p0 = scmp.ne.s32.totalorder %s1855_s7, 0 }
  0x67   : > { %1458 = dma.done.wait (%p1871_p0), [#allocation6], 64  }
  0x68   : > { %1460 = vsyncadd (%p1871_p0), [#allocation6], 4294967232  ;;  %p311_p6 = scmp.lt.s32.totalorder %s1483_s25, 1  ;;  %v1499_v0 = vmov 0.0   ;;  %vm1500_vm0 = vmmov 0   ;;  %v1501_v1 = vmov 0  }
  0x69   : > { %1126 = vmatprep.subr.mxu0 %v1499_v0  ;;  %1131 = vmatprep.subr.mxu1 %v1499_v0  ;;  %vm328_vm1 = vcmask 1043456   ;;  %vm324_vm2 = vcmask 31744   ;;  %vm409_vm3 = vcmask 64512   ;;  %v1727_v2 = vld [vmem:[%s274_s21] sm:$0xf]  ;;  %v1502_v24 = vmov 0.0|0.0  }
  0x6a   : > { %1128 = vmatprep.mubr.msk.f32.mxu0 %vm1500_vm0, %v1499_v0  ;;  %s312_s24 = scalar_select %p311_p6, %s1483_s25, 1  ;;  %1133 = vmatprep.mubr.msk.f32.mxu1 %vm1500_vm0, %v1499_v0  ;;  %v317_v4 = vld [vmem:[#allocation5] sm:$0xf]  ;;  %v402_v5 = vld [vmem:[%s1838_s4] sm:$0xff] }
  0x6b   : > { %1314 = vset.pattern.permute.xlu0 %v1501_v1  ;;  %1127 = vmatpush3.msk.msra.mxu0 %vm328_vm1, %v1727_v2  ;;  %v403_v6 = vld [vmem:[%s1839_s5] sm:$0xff]  ;;  %s1872_s12 = sld [smem:[#allocation12_spill]]  ;;  %s1084_s16 = sshll.u32 %s1483_s25, 1 }
  0x6c   : > { %s1062_s9 = sshll.u32 %s312_s24, 3  ;;  %1129 = vmatmul.mubr.msk.f32.vlgmr.msra.gmra.mrb[0].mxu0 %vm324_vm2, %v317_v4  ;;  %406 = vperm.xlu0 %1314, %v403_v6   ;;  %v318_v7 = vld [vmem:[%s1837_s3] sm:$0xf]  ;;  %s310_s24 = scalar_lea.vmem [#allocation7], %s1059_s19 }
  0x6d   : > { %s314_s7 = scalar_lea.vmem %s1835_s1, %s1062_s9  ;;  %s943_s9 = sshll.u32 %s310_s24, 4  ;;  %s1782_s9 = int_to_ptr.vmem [resolvable:$true] %s943_s9 }
  0x6e   : > { %v316_v3 = vld [vmem:[%s314_s7] sm:$0xff]  ;;  %s1874_s7 = sld [smem:[#allocation17_spill]]  ;;  %s928_s25 = scalar_lea.sflag [#allocation4], %s1706_s8 }
  0x6f   : > { %1132 = vmatpush3.msra.mxu1 %v316_v3  ;;  %s1393_s2 = scalar_lea.vmem %s1782_s9, 64  ;;  %s1503_s19 = smov [#allocation7]  }
  0x70   : > { %1134 = vmatmul.mubr.msk.f32.vlgmr.msra.gmra.mrb[0].mxu1 %vm409_vm3, %v402_v5  ;;  %321 = vperm.xlu0 %1314, %v318_v7   ;;  %p1394_p8 = scmp.ne.s32.totalorder %s1782_s9, %s1393_s2  ;;  %s1397_s20 = sshll.u32 %s1503_s19, 4  ;;  %s1398_s20 = int_to_ptr.vmem [resolvable:$false] %s1397_s20 }
  0x71   : > { %1194 = vmatprep.mubr.msk.f32.mxu1 %vm1500_vm0, %v1499_v0  ;;  %1197 = vmatprep.subr.bf16.mxu1 %v1502_v24  ;;  %s939_s6 = sadd.s32 %s1872_s12, %s1084_s16  ;;  %s1399_s13 = scalar_lea.vmem %s1398_s20, 128 }
  0x72   : > { %s1085_s21 = sshll.u32 %s939_s6, 6  ;;  %p1395_p10 = pnand %p1394_p8, %p1644_p11 }
  0x73   : > { %p1400_p13 = scmp.lt.s32.totalorder %s1782_s9, %s1398_s20  ;;  %p1401_p3 = scmp.lt.s32.totalorder %s1399_s13, %s1393_s2 }
  0x74   : > { %s1780_s14 = scalar_lea.hbm %s1874_s7, %s1085_s21  ;;  %p1396_p12 = pneg %p1395_p10 }
  0x75   : > { %p1402_p7 = por %p1401_p3, %p1400_p13 }
  0x77   : > { %p1403_p1 = pnand %p1402_p7, %p1396_p12 }
  0xeb   : > { %v407_v8 = vpop.permute.xlu0 %406 }
  0xef   : > { %v322_v9 = vpop.permute.xlu0 %321 }
 0x13f   : > { %v398_v10 = vpop.f32.mrb[0].mxu0 }
 0x140   : > { %v399_v12 = vadd.f32 %v398_v10, %v322_v9  ;;  %v1130_v15 = vpop.f32.mrb[1].mxu0 }
 0x142   : > { %1136 = vmatprep.subr.msk.mxu0 %vm328_vm1, %v399_v12 }
 0x143   : > { %v479_v11 = vpop.f32.mrb[0].mxu1  ;;  %1137 = vmatpush3.msk.msra.mxu0 %vm328_vm1, %v399_v12 }
 0x144   : > { %v1742_v13 = vadd.f32 %v479_v11, %v407_v8  ;;  %v1135_v14 = vpop.f32.mrb[1].mxu1 }
 0x146   : > { %483 = vxpose.xlu1.b32.start.end [1/1] (short) %v1742_v13, 128 }
 0x1c6   : > { %v499_v16 = vpop.trf.xlu1 }
 0x1c7   : > { %1138 = vmatprep.mubr.msk.f32.mxu0 %vm324_vm2, %v499_v16 }
 0x1ca   : > { %v500_v17 = vpop.trf.xlu1 }
 0x1cb   : > { %1139 = vmatmul.mubr.msk.f32.vlgmr.msra.gmra.mrb[2].mxu0 %vm324_vm2, %v500_v17 }
 0x1ce   : > { %v501_v18 = vpop.trf.xlu1 }
 0x1cf   : > { %1141 = vmatprep.mubr.msk.f32.mxu0 %vm324_vm2, %v501_v18 }
 0x1d2   : > { %v502_v19 = vpop.trf.xlu1 }
 0x1d3   : > { %1142 = vmatmul.mubr.msk.f32.gmra.mrb[4].mxu0 %vm324_vm2, %v502_v19 }
 0x1d6   : > { %v503_v20 = vpop.trf.xlu1 }
 0x1d7   : > { %1144 = vmatprep.mubr.msk.f32.mxu0 %vm324_vm2, %v503_v20 }
 0x1da   : > { %v504_v21 = vpop.trf.xlu1 }
 0x1db   : > { %1145 = vmatmul.mubr.msk.f32.gmra.mrb[6].mxu0 %vm324_vm2, %v504_v21 }
 0x1de   : > { %v505_v22 = vpop.trf.xlu1 }
 0x1df   : > { %1147 = vmatprep.mubr.msk.f32.mxu0 %vm324_vm2, %v505_v22 }
 0x1e2   : > { %v506_v23 = vpop.trf.xlu1 }
 0x1e3   : > { %1148 = vmatmul.mubr.msk.f32.gmra.mrb[8].mxu0 %vm324_vm2, %v506_v23 }
 0x1e6   : > { %v507_v25 = vpop.trf.xlu1 }
 0x1e7   : > { %1150 = vmatprep.mubr.msk.f32.mxu0 %vm324_vm2, %v507_v25 }
 0x1ea   : > { %v508_v26 = vpop.trf.xlu1 }
 0x1eb   : > { %1151 = vmatmul.mubr.msk.f32.gmra.mrb[10].mxu0 %vm324_vm2, %v508_v26 }
 0x1ee   : > { %v509_v27 = vpop.trf.xlu1 }
 0x1ef   : > { %1153 = vmatprep.mubr.msk.f32.mxu0 %vm324_vm2, %v509_v27 }
 0x1f2   : > { %v510_v28 = vpop.trf.xlu1 }
 0x1f3   : > { %1154 = vmatmul.mubr.msk.f32.gmra.mrb[12].mxu0 %vm324_vm2, %v510_v28 }
 0x1f6   : > { %v511_v29 = vpop.trf.xlu1 }
 0x1f7   : > { %1156 = vmatprep.mubr.msk.f32.mxu0 %vm324_vm2, %v511_v29 }
 0x1fa   : > { %v512_v30 = vpop.trf.xlu1 }
 0x1fb   : > { %1157 = vmatmul.mubr.msk.f32.gmra.mrb[14].mxu0 %vm324_vm2, %v512_v30 }
 0x1fe   : > { %v513_v31 = vpop.trf.xlu1 }
 0x1ff   : > { %1159 = vmatprep.mubr.msk.f32.mxu0 %vm324_vm2, %v513_v31 }
 0x202   : > { %v514_v32 = vpop.trf.xlu1 }
 0x203   : > { %1160 = vmatmul.mubr.msk.f32.gmra.mrb[16].mxu0 %vm324_vm2, %v514_v32 }
 0x29e   : > { %v1140_v33 = vpop.f32.mrb[2].mxu0 }
 0x29f   : > { %v632_v34 = vpop.f32.mrb[3].mxu0 }
 0x2a6   : > { %v1143_v35 = vpop.f32.mrb[4].mxu0 }
 0x2a7   : > { %v642_v36 = vpop.f32.mrb[5].mxu0 }
 0x2ae   : > { %v1146_v37 = vpop.f32.mrb[6].mxu0 }
 0x2af   : > { %v761_v38 = vmax.f32 %v1140_v33, %v1146_v37  ;;  %v652_v39 = vpop.f32.mrb[7].mxu0 }
 0x2b0   : > { %v760_v40 = vmax.f32 %v632_v34, %v652_v39 }
 0x2b1   : > { %v765_v41 = vmax.f32 %v761_v38, -1e+30 }
 0x2b2   : > { %v764_v42 = vmax.f32 %v760_v40, -1e+30 }
 0x2b3   : > { %v769_v43 = vmax.f32 %v765_v41, -1e+30 }
 0x2b4   : > { %v768_v44 = vmax.f32 %v764_v42, -1e+30 }
 0x2b6   : > { %v772_v45 = vmax.f32 %v768_v44, %v769_v43  ;;  %v1149_v46 = vpop.f32.mrb[8].mxu0 }
 0x2b7   : > { %v763_v47 = vmax.f32 %v1143_v35, %v1149_v46  ;;  %v662_v48 = vpop.f32.mrb[9].mxu0 }
 0x2b8   : > { %v762_v49 = vmax.f32 %v642_v36, %v662_v48 }
 0x2b9   : > { %v767_v50 = vmax.f32 %v763_v47, -1e+30 }
 0x2ba   : > { %v766_v51 = vmax.f32 %v762_v49, -1e+30 }
 0x2bb   : > { %v771_v52 = vmax.f32 %v767_v50, -1e+30 }
 0x2bc   : > { %v770_v53 = vmax.f32 %v766_v51, -1e+30 }
 0x2be   : > { %v773_v54 = vmax.f32 %v770_v53, %v771_v52  ;;  %v1152_v49 = vpop.f32.mrb[10].mxu0 }
 0x2bf   : > { %v672_v50 = vpop.f32.mrb[11].mxu0 }
 0x2c0   : > { %v774_v55 = vmax.f32 %v772_v45, %v773_v54 }
 0x2c2   : > { %v775_v56 = vrot.slane %v774_v55, 4 }
 0x2c4   : > { %v776_v57 = vmax.f32 %v774_v55, %v775_v56 }
 0x2c6   : > { %v777_v58 = vrot.slane %v776_v57, 2  ;;  %v1155_v51 = vpop.f32.mrb[12].mxu0 }
 0x2c7   : > { %v682_v52 = vpop.f32.mrb[13].mxu0 }
 0x2c8   : > { %v778_v59 = vmax.f32 %v776_v57, %v777_v58 }
 0x2ca   : > { %v779_v60 = vrot.slane %v778_v59, 1 }
 0x2cc   : > { %v780_v61 = vmax.f32 %v778_v59, %v779_v60 }
 0x2ce   : > { %v781_v62 = vsub.f32 %v632_v34, %v780_v61  ;;  %v782_v63 = vsub.f32 %v1140_v33, %v780_v61  ;;  %v783_v0 = vsub.f32 %v642_v36, %v780_v61  ;;  %v784_v1 = vsub.f32 %v1143_v35, %v780_v61  ;;  %v1158_v53 = vpop.f32.mrb[14].mxu0 }
 0x2cf   : > { %v785_v3 = vsub.f32 %v652_v39, %v780_v61  ;;  %v786_v4 = vsub.f32 %v1146_v37, %v780_v61  ;;  %v787_v5 = vsub.f32 %v662_v48, %v780_v61  ;;  %v788_v6 = vsub.f32 %v1149_v46, %v780_v61  ;;  %v692_v54 = vpop.f32.mrb[15].mxu0 }
 0x2d0   : > { %v797_v7 = vmul.f32 1.442695, %v781_v62  ;;  %v799_v8 = vmul.f32 1.442695, %v782_v63  ;;  %v801_v9 = vmul.f32 1.442695, %v783_v0 }
 0x2d1   : > { %v803_v10 = vmul.f32 1.442695, %v784_v1  ;;  %v805_v11 = vmul.f32 1.442695, %v785_v3  ;;  %v807_v12 = vmul.f32 1.442695, %v786_v4 }
 0x2d2   : > { %1315 = vpow2.f32 %v797_v7  ;;  %v809_v14 = vmul.f32 1.442695, %v787_v5  ;;  %v811_v15 = vmul.f32 1.442695, %v788_v6  ;;  %v789_v16 = vsub.f32 -1e+30, %v780_v61 }
 0x2d3   : > { %1317 = vpow2.f32 %v799_v8  ;;  %v852_v48 = vrot.slane %v1742_v13, 4 }
 0x2d4   : > { %1319 = vpow2.f32 %v801_v9  ;;  %v813_v19 = vmul.f32 1.442695, %v789_v16 }
 0x2d5   : > { %1321 = vpow2.f32 %v803_v10 }
 0x2d6   : > { %1323 = vpow2.f32 %v805_v11  ;;  %v1161_v55 = vpop.f32.mrb[16].mxu0 }
 0x2d7   : > { %1325 = vpow2.f32 %v807_v12  ;;  %v702_v56 = vpop.f32.mrb[17].mxu0 }
 0x2d8   : > { %1327 = vpow2.f32 %v809_v14 }
 0x2d9   : > { %1329 = vpow2.f32 %v811_v15 }
 0x2da   : > { %1331 = vpow2.f32 %v813_v19 }
 0x2dc   : > { %v1316_v17 = vpop.eup %1315 }
 0x2dd   : > { %v1318_v18 = vpop.eup %1317 }
 0x2de   : > { %v1320_v20 = vpop.eup %1319  ;;  %v829_v21 = vadd.f32 %v1318_v18, %v1316_v17  ;;  %v1198_v22 = vpack.c.bf16 %v1318_v18, %v1316_v17 }
 0x2df   : > { %v1322_v23 = vpop.eup %1321 }
 0x2e0   : > { %v1324_v25 = vpop.eup %1323  ;;  %v830_v26 = vadd.f32 %v1320_v20, %v829_v21  ;;  %1199 = vmatpush3.bf16.msra.mxu1 %v1198_v22  ;;  %v1201_v27 = vpack.c.bf16 %v1322_v23, %v1320_v20 }
 0x2e1   : > { %v1326_v28 = vpop.eup %1325  ;;  %1200 = vmatprep.subr.bf16.mxu1 %v1502_v24 }
 0x2e2   : > { %v1328_v29 = vpop.eup %1327  ;;  %v831_v30 = vadd.f32 %v1322_v23, %v830_v26  ;;  %v1204_v31 = vpack.c.bf16 %v1326_v28, %v1324_v25 }
 0x2e3   : > { %v1330_v32 = vpop.eup %1329 }
 0x2e4   : > { %v832_v33 = vadd.f32 %v1324_v25, %v831_v30  ;;  %1202 = vmatpush3.bf16.msra.mxu1 %v1201_v27  ;;  %v1207_v34 = vpack.c.bf16 %v1330_v32, %v1328_v29  ;;  %v1332_v38 = vpop.eup %1331 }
 0x2e5   : > { %1203 = vmatprep.subr.bf16.mxu1 %v1502_v24  ;;  %v1210_v41 = vpack.c.bf16 %v1332_v38, %v1332_v38 }
 0x2e6   : > { %v833_v35 = vadd.f32 %v1326_v28, %v832_v33 }
 0x2e8   : > { %v834_v36 = vadd.f32 %v1328_v29, %v833_v35  ;;  %1205 = vmatpush3.bf16.msra.mxu1 %v1204_v31 }
 0x2e9   : > { %1206 = vmatprep.subr.bf16.mxu1 %v1502_v24 }
 0x2ea   : > { %v835_v37 = vadd.f32 %v1330_v32, %v834_v36 }
 0x2ec   : > { %v836_v39 = vadd.f32 %v1332_v38, %v835_v37  ;;  %1208 = vmatpush3.bf16.msra.mxu1 %v1207_v34 }
 0x2ed   : > { %1209 = vmatprep.subr.bf16.mxu1 %v1502_v24 }
 0x2ee   : > { %v837_v40 = vadd.f32 %v1332_v38, %v836_v39 }
 0x2f0   : > { %v838_v42 = vadd.f32 %v1332_v38, %v837_v40  ;;  %1211 = vmatpush3.bf16.msra.mxu1 %v1210_v41 }
 0x2f1   : > { %1212 = vmatprep.subr.bf16.mxu1 %v1502_v24 }
 0x2f2   : > { %v839_v43 = vadd.f32 %v1332_v38, %v838_v42 }
 0x2f4   : > { %1214 = vmatpush3.bf16.msra.mxu1 %v1210_v41  ;;  %v840_v44 = vadd.f32 %v1332_v38, %v839_v43 }
 0x2f5   : > { %1215 = vmatprep.subr.bf16.mxu1 %v1502_v24 }
 0x2f6   : > { %v841_v45 = vadd.f32 %v1332_v38, %v840_v44 }
 0x2f8   : > { %1217 = vmatpush3.bf16.msra.mxu1 %v1210_v41  ;;  %v842_v46 = vadd.f32 %v1332_v38, %v841_v45 }
 0x2f9   : > { %1218 = vmatprep.subr.bf16.mxu1 %v1502_v24 }
 0x2fa   : > { %v843_v47 = vadd.f32 %v1332_v38, %v842_v46 }
 0x2fc   : > { %1220 = vmatpush3.bf16.msra.mxu1 %v1210_v41  ;;  %v844_v57 = vrot.slane %v843_v47, 4 }
 0x2fe   : > { %v845_v58 = vadd.f32 %v844_v57, %v843_v47 }
 0x2ff   : > { %1195 = vmatmul.mubr.f32.vlgmr.msra.gmra.mrb[2].mxu1 %v852_v48 }
 0x300   : > { %v846_v59 = vrot.slane %v845_v58, 2 }
 0x302   : > { %v847_v24 = vadd.f32 %v846_v59, %v845_v58 }
 0x304   : > { %v848_v60 = vrot.slane %v847_v24, 1 }
 0x306   : > { %v849_v61 = vadd.f32 %v848_v60, %v847_v24 }
 0x308   : > { %1333 = vrcp.f32 %v849_v61 }
 0x312   : > { %v1334_v13 = vpop.eup %1333 }
 0x3d2   : > { %v920_v62 = vpop.f32.mrb[2].mxu1 }
 0x3d3   : > { %v924_v63 = vmul.f32 %v1334_v13, %v920_v62  ;;  %v1196_v0 = vpop.f32.mrb[3].mxu1 }
 0x3d5   : > { %v925_v1 = vadd.f32 %v924_v63, %v1727_v2 }
 0x3d7   : > { %926 = vst [vmem:[%s310_s24] sm:$0xf] %v925_v1 }
 0x3d8   : > { %1406 = shalt.err (!%p1403_p1)
}
 0x3d9   : > { %s1407_s8 = scalar_lea.hbm %s1780_s14, 64  ;;  %s1411_s12 = scalar_lea.hbm %s1874_s7, 256 }
 0x3da   : > { %p1408_p2 = scmp.ne.s32.totalorder %s1780_s14, %s1407_s8  ;;  %p1412_p5 = scmp.lt.u32.totalorder %s1780_s14, %s1874_s7 }
 0x3db   : > { %p1413_p0 = scmp.lt.u32.totalorder %s1411_s12, %s1407_s8  ;;  %p1415_p8 = scmp.lt.u32.totalorder %s1407_s8, %s1780_s14 }
 0x3dc   : > { %p1409_p4 = pnand %p1408_p2, %p1644_p11 }
 0x3dd   : > { %p1414_p6 = por %p1413_p0, %p1412_p5 }
 0x3de   : > { %p1410_p9 = pneg %p1409_p4 }
 0x3df   : > { %p1416_p10 = por %p1415_p8, %p1414_p6 }
 0x3e1   : > { %p1417_p12 = pnand %p1416_p10, %p1410_p9 }
 0x3e3   : > { %1420 = shalt.err (!%p1417_p12)
}
 0x3e4   : > { %1227 = dma.vmem_to_hbm [thread:$0]  (%p1644_p11), %s1782_s9, 64, %s1780_s14, %s928_s25  }
 0x3e5 PF: > { %s1875_s21 = sld [smem:[#allocation11_spill]]  ;;  %s1876_s24 = sld [smem:[#allocation13_spill]] }
 0x3e6   : > { %p1244_p13 = scmp.ge.s32.totalorder %s1495_s28, 2 }
 0x3eb   : > { %s955_s11 = sand.u32 1, %s1875_s21   ;;  %p1877_p3 = scmp.ne.s32.totalorder %s1876_s24, 0 }
 0x3ec   : > { %s956_s15 = scalar_lea.sflag [#allocation4], %s955_s11 }
 0x3ed   : > { %p1238_p7 = pnand %p1244_p13, %p1877_p3 }
 0x3ef   : > { %1462 = dma.done.wait (!%p1238_p7), %s956_s15, 64  }
 0x3f0   : > { %1464 = vsyncadd (!%p1238_p7), %s956_s15, 4294967232  ;;  %s23_s28 = sadd.s32 1, %s1495_s28   ;;  %s1878_s17 = sld [smem:[#allocation14_spill]] }
 0x3f1   : > { %p20_p1 = scmp.ge.s32.totalorder %s23_s28, 6   ;;  %s1879_s21 = smov %s1471_s22 }
 0x3f2   : > { %s1880_s22 = smov %s1475_s23  ;;  %s1881_s23 = smov %s1661_s10 }
 0x3f3   : > { %s1882_s24 = smov %s1487_s26  ;;  %s1883_s25 = smov %s1491_s27 }
 0x3f4   : > { %s1885_s27 = smov %s1891_s18  ;;  %22 = sbr.rel (!%p20_p1) target bundleno = 11 (0xb), region = 96 }
 0x3f6   : > { %s1884_s26 = smov %s1878_s17 }
 0x3fb   :  { %961 = vsyncpa [#allocation3], 1 }
 0x3fc   :  { %963 = vsyncpa [#allocation3 + $0x1], 1 }
 0x3fd   :  { %964 = vsyncpa [#allocation6], 1 }
 0x3fe   :  { %965 = vsyncpa [#allocation4], 1 }
 0x3ff   :  { %967 = vsyncpa [#allocation4 + $0x1], 1 }

</bundles_post_ra>
